<compile_context>
chip_gen: v5e
topology: v5e:2x2
jax: 0.10.0
libtpu: 0.0.40
codegen_flags: <defaults>
</compile_context>

<pallas_src>
import math

import jax
import jax.numpy as jnp
from jax.experimental import pallas as pl
from jax.experimental.pallas import tpu as pltpu


# Reciprocal of the PyTorch source constant 1.41421 (intentionally not sqrt(2)).
_INV_1_41421 = float(1.0 / 1.41421)

# Only request single-buffering for grid-invariant weights when the saved buffer is
# actually significant (keeps small shapes on the plain, default pipeline path).
_SINGLE_BUFFER_MIN_BYTES = 2 * 1024 * 1024


def _erf_f32(x):
    """Eigen/XLA-style rational approximation of erf(x) for float32 inputs."""
    c = jnp.float32(3.832506856900711)          # clamp point: erf(c) == 1 - O(ulp)
    x = jnp.maximum(jnp.minimum(x, c), -c)
    x2 = x * x
    # numerator polynomial (odd): x * P(x^2)
    a = jnp.float32(-2.72614225801306e-10)
    a = a * x2 + jnp.float32(2.77068142495902e-08)
    a = a * x2 + jnp.float32(-2.10102402082508e-06)
    a = a * x2 + jnp.float32(-5.69250639462346e-05)
    a = a * x2 + jnp.float32(-7.34990630326855e-04)
    a = a * x2 + jnp.float32(-2.95459980854025e-03)
    a = a * x2 + jnp.float32(-1.60960333262415e-02)
    num = x * a
    # denominator polynomial (even): Q(x^2)
    b = jnp.float32(-1.45660718464996e-05)
    b = b * x2 + jnp.float32(-2.13374055278905e-04)
    b = b * x2 + jnp.float32(-1.68282697438203e-03)
    b = b * x2 + jnp.float32(-7.37332916720468e-03)
    b = b * x2 + jnp.float32(-1.42647390514189e-02)
    # Exact divide kept for 1e-4 parity (approx reciprocal error ~2^-12 is borderline).
    return num / b


def _linear_bias_gelu_kernel(x_ref, w_ref, b_ref, o_ref, acc_ref):
    """One (tm, tn) output tile; K is the trailing 'arbitrary' reduction axis.

    x_ref  : (tm, tk) activation tile, native dtype
    w_ref  : (tk, tn) pre-transposed weight tile, native dtype
    b_ref  : (1, tn)  bias tile (free sublane broadcast)
    o_ref  : (tm, tn) output tile
    acc_ref: (tm, tn) f32 accumulator scratch (persists across K steps)
    """
    k = pl.program_id(2)

    @pl.when(k == 0)
    def _init():
        acc_ref[...] = jnp.zeros_like(acc_ref)

    # Native-dtype operands into the MXU, f32 accumulation.
    acc_ref[...] += jnp.dot(x_ref[...], w_ref[...],
                            preferred_element_type=jnp.float32)

    @pl.when(k == pl.num_programs(2) - 1)
    def _epilogue():
        # bias_gelu: z = float(bias) + float(y);  z * 0.5 * (1 + erf(z / 1.41421))
        z = acc_ref[...] + b_ref[...].astype(jnp.float32)
        g = z * jnp.float32(0.5) * (jnp.float32(1.0)
                                    + _erf_f32(z * jnp.float32(_INV_1_41421)))
        o_ref[...] = g.astype(o_ref.dtype)


def _round_up(v, m):
    return (v + m - 1) // m * m


def _choose_m_tile(m):
    """Row-tile: <=256, multiple of 8, and >=2 grid steps when the shape allows
    (so a 2-TensorCore chip can shard the 'parallel' row axis)."""
    m8 = _round_up(max(m, 1), 8)
    tm = min(256, m8)
    if m8 // tm < 2 and m8 >= 16:
        tm = max(8, (m8 // 2) // 8 * 8)
    return tm


def _choose_minor_tile(dim, preferred):
    """Largest 128-aligned tile <= preferred that divides dim, else the full dim
    (a block extent equal to the full array dim is always legal)."""
    if dim <= preferred:
        return dim
    for t in (1024, 512, 256, 128):
        if t <= preferred and dim % t == 0:
            return t
    return dim


def prepare_weight(weight):
    """Hoist the (out, in) -> (in, out) transpose out of the per-call hot path.

    Call once at parameter-load time; the kernel then consumes the
    (in_features, out_features) layout directly (no per-forward HBM transpose,
    no in-kernel XLU transpose)."""
    return jnp.asarray(weight).T


def linear_gelu(x, w_t, bias):
    """Fused LinearActivation forward (fused_gelu path).

    x    : (..., in_features)  -- any float dtype; fed to the MXU natively
    w_t  : (in_features, out_features) -- pre-transposed weight (see prepare_weight)
    bias : (out_features,)
    returns (..., out_features), dtype of x
    """
    lead = x.shape[:-1]
    in_f = x.shape[-1]
    out_f = w_t.shape[1]
    m = math.prod(lead) if lead else 1

    x2 = x.reshape(m, in_f)
    b2 = bias.reshape(1, out_f)          # 2-D bias -> free sublane broadcast

    tm = _choose_m_tile(m)
    tn = _choose_minor_tile(out_f, 512)  # lane-dense, 256-friendly output tiles
    tk = _choose_minor_tile(in_f, 1024)

    m_pad = _round_up(m, tm)
    if m_pad != m:
        x2 = jnp.pad(x2, ((0, m_pad - m), (0, 0)))

    grid_m = m_pad // tm
    grid_n = out_f // tn
    grid_k = in_f // tk

    # Weight tile is grid-invariant when it is not tiled along N or K; in that case a
    # second pipeline buffer is pure VMEM waste (matters on v7x's 64 MiB VMEM).
    w_tile_bytes = tk * tn * jnp.dtype(w_t.dtype).itemsize
    if grid_n == 1 and grid_k == 1 and w_tile_bytes >= _SINGLE_BUFFER_MIN_BYTES:
        w_spec = pl.BlockSpec((tk, tn), lambda i, j, k: (k, j),
                              pipeline_mode=pl.Buffered(1))
    else:
        w_spec = pl.BlockSpec((tk, tn), lambda i, j, k: (k, j))

    out_dtype = x.dtype
    cost = pl.CostEstimate(
        flops=2 * m_pad * out_f * in_f,
        transcendentals=0,
        bytes_accessed=(x2.size * x2.dtype.itemsize
                        + w_t.size * w_t.dtype.itemsize
                        + b2.size * b2.dtype.itemsize
                        + m_pad * out_f * jnp.dtype(out_dtype).itemsize),
    )

    out = pl.pallas_call(
        _linear_bias_gelu_kernel,
        out_shape=jax.ShapeDtypeStruct((m_pad, out_f), out_dtype),
        grid_spec=pltpu.PrefetchScalarGridSpec(
            num_scalar_prefetch=0,
            grid=(grid_m, grid_n, grid_k),
            in_specs=[
                pl.BlockSpec((tm, tk), lambda i, j, k: (i, k)),
                w_spec,
                pl.BlockSpec((1, tn), lambda i, j, k: (0, j)),
            ],
            out_specs=pl.BlockSpec((tm, tn), lambda i, j, k: (i, j)),
            scratch_shapes=[pltpu.VMEM((tm, tn), jnp.float32)],
        ),
        compiler_params=pltpu.CompilerParams(
            dimension_semantics=("parallel", "parallel", "arbitrary"),
            vmem_limit_bytes=32 * 1024 * 1024,   # tile budget fits v5e/v6e/v7x
        ),
        cost_estimate=cost,
    )(x2, w_t, b2)

    if m_pad != m:
        out = out[:m]
    return out.reshape(*lead, out_f)


def reference(x, weight, bias):
    """Plain-JAX reference mirroring the PyTorch fused_gelu forward."""
    y = jnp.dot(x, weight.T, precision=jax.lax.Precision.HIGHEST)
    z = bias.astype(jnp.float32) + y.astype(jnp.float32)
    g = z * 0.5 * (1.0 + jax.scipy.special.erf(z / 1.41421))
    return g.astype(x.dtype)


if __name__ == "__main__":
    # Small BERT-ish shapes: hidden=32 -> intermediate=128 (lane-dense output).
    B, S = 2, 8
    IN_F, OUT_F = 32, 128

    key = jax.random.PRNGKey(0)
    kx, kw, kb = jax.random.split(key, 3)

    x = jax.random.normal(kx, (B, S, IN_F), jnp.float32)
    # PyTorch nn.Linear layout: weight is (out_features, in_features).
    weight = jax.random.normal(kw, (OUT_F, IN_F), jnp.float32) * 0.2
    bias = jax.random.normal(kb, (OUT_F,), jnp.float32) * 0.5

    w_t = prepare_weight(weight)             # transpose hoisted out of the hot path
    out = linear_gelu(x, w_t, bias)
    out = jax.block_until_ready(out)

    ref = reference(x, weight, bias)
    assert out.shape == (B, S, OUT_F)
    err = float(jnp.max(jnp.abs(out - ref)))
    assert jnp.allclose(out, ref, atol=1e-4, rtol=1e-4), f"mismatch vs reference, max abs err={err}"

    print("KERNEL_OK")
</pallas_src>

<mosaic_0001>
module attributes {stable_mosaic.version = 11 : i64} {
  func.func @_linear_bias_gelu_kernel(%arg0: i32, %arg1: i32, %arg2: i32, %arg3: memref<8x32xf32, #tpu.memory_space<vmem>>, %arg4: memref<32x128xf32, #tpu.memory_space<vmem>>, %arg5: memref<1x128xf32, #tpu.memory_space<vmem>>, %arg6: memref<8x128xf32, #tpu.memory_space<vmem>>, %arg7: memref<8x128xf32, #tpu.memory_space<vmem>>) attributes {dimension_semantics = [#tpu.dimension_semantics<parallel>, #tpu.dimension_semantics<parallel>, #tpu.dimension_semantics<arbitrary>], iteration_bounds = array<i64: 2, 1, 1>, scalar_prefetch = 0 : i64, scratch_operands = 1 : i64, tpu.core_type = #tpu.core_type<tc>, window_params = [{transform_indices = @transform_0, window_bounds = array<i64: 8, 32>}, {transform_indices = @transform_1, window_bounds = array<i64: 32, 128>}, {transform_indices = @transform_2, window_bounds = array<i64: 1, 128>}, {transform_indices = @transform_3, window_bounds = array<i64: 8, 128>}]} {
    %c0_i32 = arith.constant 0 : i32
    %0 = arith.cmpi eq, %arg2, %c0_i32 : i32
    %1 = arith.extui %0 : i1 to i32
    %c0_i32_0 = arith.constant 0 : i32
    %2 = arith.cmpi ne, %1, %c0_i32_0 : i32
    scf.if %2 {
      %cst_10 = arith.constant 0.000000e+00 : f32
      %12 = vector.broadcast %cst_10 : f32 to vector<8x128xf32>
      %c0_11 = arith.constant 0 : index
      %c0_12 = arith.constant 0 : index
      %13 = vector.load %arg7[%c0_11, %c0_12] : memref<8x128xf32, #tpu.memory_space<vmem>>, vector<8x128xf32>
      tpu.vector_store %arg7[%c0_11, %c0_12], %12 {strides = array<i32>} : memref<8x128xf32, #tpu.memory_space<vmem>>, vector<8x128xf32>,
    } else {
    }
    %c0 = arith.constant 0 : index
    %c0_1 = arith.constant 0 : index
    %3 = vector.load %arg7[%c0, %c0_1] : memref<8x128xf32, #tpu.memory_space<vmem>>, vector<8x128xf32>
    %c0_2 = arith.constant 0 : index
    %c0_3 = arith.constant 0 : index
    %4 = vector.load %arg3[%c0_2, %c0_3] : memref<8x32xf32, #tpu.memory_space<vmem>>, vector<8x32xf32>
    %c0_4 = arith.constant 0 : index
    %c0_5 = arith.constant 0 : index
    %5 = vector.load %arg4[%c0_4, %c0_5] : memref<32x128xf32, #tpu.memory_space<vmem>>, vector<32x128xf32>
    %cst = arith.constant dense<0.000000e+00> : vector<8x128xf32>
    %6 = tpu.matmul %4, %5, %cst {dimension_numbers = #tpu.dot_dimension_numbers<[1], [0], [0], [1], [0, 0, 1, 1], [], []>} : vector<8x32xf32>, vector<32x128xf32>, vector<8x128xf32> -> vector<8x128xf32>
    %7 = arith.addf %3, %6 : vector<8x128xf32>
    %c0_6 = arith.constant 0 : index
    %c0_7 = arith.constant 0 : index
    %8 = vector.load %arg7[%c0_6, %c0_7] : memref<8x128xf32, #tpu.memory_space<vmem>>, vector<8x128xf32>
    tpu.vector_store %arg7[%c0_6, %c0_7], %7 {strides = array<i32>} : memref<8x128xf32, #tpu.memory_space<vmem>>, vector<8x128xf32>,
    %c0_i32_8 = arith.constant 0 : i32
    %9 = arith.cmpi eq, %arg2, %c0_i32_8 : i32
    %10 = arith.extui %9 : i1 to i32
    %c0_i32_9 = arith.constant 0 : i32
    %11 = arith.cmpi ne, %10, %c0_i32_9 : i32
    scf.if %11 {
      %c0_10 = arith.constant 0 : index
      %c0_11 = arith.constant 0 : index
      %12 = vector.load %arg7[%c0_10, %c0_11] : memref<8x128xf32, #tpu.memory_space<vmem>>, vector<8x128xf32>
      %c0_12 = arith.constant 0 : index
      %c0_13 = arith.constant 0 : index
      %13 = vector.load %arg5[%c0_12, %c0_13] : memref<1x128xf32, #tpu.memory_space<vmem>>, vector<1x128xf32>
      %14 = vector.broadcast %13 : vector<1x128xf32> to vector<8x128xf32>
      %15 = arith.addf %12, %14 : vector<8x128xf32>
      %cst_14 = arith.constant 5.000000e-01 : f32
      %16 = vector.broadcast %cst_14 : f32 to vector<8x128xf32>
      %17 = arith.mulf %15, %16 : vector<8x128xf32>
      %cst_15 = arith.constant 0.707108557 : f32
      %18 = vector.broadcast %cst_15 : f32 to vector<8x128xf32>
      %19 = arith.mulf %15, %18 : vector<8x128xf32>
      %cst_16 = arith.constant 3.8325069 : f32
      %20 = vector.broadcast %cst_16 : f32 to vector<8x128xf32>
      %21 = arith.minimumf %19, %20 : vector<8x128xf32>
      %cst_17 = arith.constant 0.000000e+00 : f32
      %cst_18 = arith.constant 3.8325069 : f32
      %22 = arith.subf %cst_17, %cst_18 : f32
      %23 = vector.broadcast %22 : f32 to vector<8x128xf32>
      %24 = arith.maximumf %21, %23 : vector<8x128xf32>
      %25 = arith.mulf %24, %24 : vector<8x128xf32>
      %cst_19 = arith.constant -2.72614237E-10 : f32
      %26 = vector.broadcast %cst_19 : f32 to vector<8x128xf32>
      %27 = arith.mulf %26, %25 : vector<8x128xf32>
      %cst_20 = arith.constant 2.77068146E-8 : f32
      %28 = vector.broadcast %cst_20 : f32 to vector<8x128xf32>
      %29 = arith.addf %27, %28 : vector<8x128xf32>
      %30 = arith.mulf %29, %25 : vector<8x128xf32>
      %cst_21 = arith.constant -2.10102394E-6 : f32
      %31 = vector.broadcast %cst_21 : f32 to vector<8x128xf32>
      %32 = arith.addf %30, %31 : vector<8x128xf32>
      %33 = arith.mulf %32, %25 : vector<8x128xf32>
      %cst_22 = arith.constant -5.69250624E-5 : f32
      %34 = vector.broadcast %cst_22 : f32 to vector<8x128xf32>
      %35 = arith.addf %33, %34 : vector<8x128xf32>
      %36 = arith.mulf %35, %25 : vector<8x128xf32>
      %cst_23 = arith.constant -7.34990637E-4 : f32
      %37 = vector.broadcast %cst_23 : f32 to vector<8x128xf32>
      %38 = arith.addf %36, %37 : vector<8x128xf32>
      %39 = arith.mulf %38, %25 : vector<8x128xf32>
      %cst_24 = arith.constant -2.954600e-03 : f32
      %40 = vector.broadcast %cst_24 : f32 to vector<8x128xf32>
      %41 = arith.addf %39, %40 : vector<8x128xf32>
      %42 = arith.mulf %41, %25 : vector<8x128xf32>
      %cst_25 = arith.constant -0.0160960332 : f32
      %43 = vector.broadcast %cst_25 : f32 to vector<8x128xf32>
      %44 = arith.addf %42, %43 : vector<8x128xf32>
      %45 = arith.mulf %24, %44 : vector<8x128xf32>
      %cst_26 = arith.constant -1.45660715E-5 : f32
      %46 = vector.broadcast %cst_26 : f32 to vector<8x128xf32>
      %47 = arith.mulf %46, %25 : vector<8x128xf32>
      %cst_27 = arith.constant -2.13374049E-4 : f32
      %48 = vector.broadcast %cst_27 : f32 to vector<8x128xf32>
      %49 = arith.addf %47, %48 : vector<8x128xf32>
      %50 = arith.mulf %49, %25 : vector<8x128xf32>
      %cst_28 = arith.constant -0.00168282702 : f32
      %51 = vector.broadcast %cst_28 : f32 to vector<8x128xf32>
      %52 = arith.addf %50, %51 : vector<8x128xf32>
      %53 = arith.mulf %52, %25 : vector<8x128xf32>
      %cst_29 = arith.constant -0.00737332925 : f32
      %54 = vector.broadcast %cst_29 : f32 to vector<8x128xf32>
      %55 = arith.addf %53, %54 : vector<8x128xf32>
      %56 = arith.mulf %55, %25 : vector<8x128xf32>
      %cst_30 = arith.constant -0.0142647391 : f32
      %57 = vector.broadcast %cst_30 : f32 to vector<8x128xf32>
      %58 = arith.addf %56, %57 : vector<8x128xf32>
      %59 = arith.divf %45, %58 : vector<8x128xf32>
      %cst_31 = arith.constant 1.000000e+00 : f32
      %60 = vector.broadcast %cst_31 : f32 to vector<8x128xf32>
      %61 = arith.addf %60, %59 : vector<8x128xf32>
      %62 = arith.mulf %17, %61 : vector<8x128xf32>
      %c0_32 = arith.constant 0 : index
      %c0_33 = arith.constant 0 : index
      %63 = vector.load %arg6[%c0_32, %c0_33] : memref<8x128xf32, #tpu.memory_space<vmem>>, vector<8x128xf32>
      tpu.vector_store %arg6[%c0_32, %c0_33], %62 {strides = array<i32>} : memref<8x128xf32, #tpu.memory_space<vmem>>, vector<8x128xf32>,
    } else {
    }
    return
  }
  func.func @transform_0(%arg0: i32, %arg1: i32, %arg2: i32) -> (i32, i32) {
    %c0_i32 = arith.constant 0 : i32
    return %arg0, %arg2 : i32, i32
  }
  func.func @transform_1(%arg0: i32, %arg1: i32, %arg2: i32) -> (i32, i32) {
    %c0_i32 = arith.constant 0 : i32
    return %arg2, %arg1 : i32, i32
  }
  func.func @transform_2(%arg0: i32, %arg1: i32, %arg2: i32) -> (i32, i32) {
    %c0_i32 = arith.constant 0 : i32
    %c0_i32_0 = arith.constant 0 : i32
    return %c0_i32, %arg1 : i32, i32
  }
  func.func @transform_3(%arg0: i32, %arg1: i32, %arg2: i32) -> (i32, i32) {
    %c0_i32 = arith.constant 0 : i32
    return %arg0, %arg1 : i32, i32
  }
}

</mosaic_0001>

<bundles_post_ra>
// kernel: tpu_custom_call.1
= control target key start
LH: loop header
LB: loop body
LE: loop exit
PB: predicated region body
PF: predicated region fallthrough
CT: control target
= control target key end

     0   :  { %8 = vsyncpa [#allocation4], 0  ;;  %s888_s0 = inlined_call_operand.hbm [shape: f32[16,32], index: 0, kind: input, shape index: {}]   ;;  %s889_s1 = inlined_call_operand.hbm [shape: f32[32,128], index: 1, kind: input, shape index: {}]   ;;  %s890_s2 = inlined_call_operand.vmem [shape: f32[1,128], index: 2, kind: input, shape index: {}]   ;;  %s891_s3 = inlined_call_operand.hbm [shape: f32[16,128], index: 3, kind: output, shape index: {}]  }
   0x1   :  { %10 = vsyncpa [#allocation4 + $0x1], 0 }
   0x2   :  { %11 = vsyncpa [#allocation7], 0 }
   0x3   :  { %12 = vsyncpa [#allocation5], 0 }
   0x4   :  { %14 = vsyncpa [#allocation5 + $0x1], 0  ;;  %s738_s12 = smov 0   ;;  %s740_s13 = smov 0  }
   0x5   :  { %s742_s14 = smov 0   ;;  %s744_s15 = smov 0  }
   0x6   :  { %s746_s16 = smov 0   ;;  %s748_s17 = smov 0  }
   0x7 LB: > { %s471_s18 = sadd.s32 4294967295, %s713_s17   ;;  %p473_p0 = scmp.ge.s32.totalorder %s713_s17, 1  ;;  %s713_s17 = sphi %s748_s17, %s20_s17   ;;  %s709_s16 = sphi %s746_s16, %s902_s16   ;;  %s705_s15 = sphi %s744_s15, %s901_s15   ;;  %s701_s14 = sphi %s742_s14, %s900_s14   ;;  %s697_s13 = sphi %s740_s13, %s899_s13   ;;  %s693_s12 = sphi %s738_s12, %s898_s12  }
   0x8   : > { %p770_p1 = scmp.eq.s32.totalorder %s471_s18, 0  ;;  %p154_p2 = scmp.lt.s32.totalorder %s713_s17, 3 }
   0x9   : > { %s169_s22 = sshll.u32 %s889_s1, 4  ;;  %s715_s24 = smov [#allocation6]   ;;  %s170_s22 = int_to_ptr.hbm [resolvable:$true] %s169_s22 }
   0xa   : > { %p778_p3 = pnand %p473_p0, %p154_p2  ;;  %s171_s25 = sshll.u32 %s715_s24, 4  ;;  %s172_s25 = int_to_ptr.vmem [resolvable:$true] %s171_s25 }
   0xb   : > { %p476_p6 = scmp.ge.s32.totalorder %s713_s17, 2  ;;  %s716_s26 = smov 128  }
   0xc   : > { %p497_p4 = pneg %p778_p3  ;;  %s717_s27 = smov 8  }
   0xd   : > { %s472_s28 = sadd.s32 4294967294, %s713_s17   ;;  %s39_s29 = sadd.s32 1, %s709_s16 }
   0xe   : > { %p498_p5 = pnand %p497_p4, %p770_p1  ;;  %s48_s30 = sadd.s32 1, %s701_s14 }
   0xf   : > { %p41_p7 = scmp.ge.s32.totalorder %s39_s29, 2  ;;  %p55_p8 = scmp.ne.s32.totalorder %s701_s14, %s697_s13 }
  0x10   : > { %500 = dma.hbm_to_vmem [thread:$0]  (!%p498_p5), %s170_s22, 512, %s172_s25, [#allocation7], %s716_s26, %s716_s26, %s717_s27  }
  0x11   : > { %p56_p9 = scmp.eq.s32.totalorder %s713_s17, 0  ;;  %p61_p10 = scmp.ne.s32.totalorder %s697_s13, %s693_s12 }
  0x12   : > { %s904_s29 = smov (%p41_p7, %s39_s29), 0  ;;  %p141_p13 = scmp.eq.s32.totalorder %s471_s18, 1 }
  0x13   : > { %p797_p11 = por %p56_p9, %p55_p8  ;;  %p803_p12 = por %p770_p1, %p61_p10 }
  0x14   : > { %s43_s6 = ssub.s32 %s709_s16, %s904_s29  ;;  %p147_p2 = scmp.eq.s32.totalorder %s472_s28, 1 }
  0x15   : > { %p46_p0 = scmp.eq.s32.totalorder %s43_s6, 0  ;;  %p809_p4 = por %p141_p13, %p55_p8 }
  0x16   : > { %p510_p5 = scmp.lt.s32.totalorder %s713_s17, 2  ;;  %p817_p7 = por %p147_p2, %p61_p10 }
  0x17   : > { %s815_s8 = scalar_select %p46_p0, %s701_s14, %s48_s30  }
  0x18   : > { %s191_s10 = sand.u32 1, %s701_s14   ;;  %s478_s20 = sshll.u32 %s709_s16, 3 }
  0x19   : > { %s477_s11 = sshll.u32 %s191_s10, 3  ;;  %s200_s18 = scalar_lea.hbm %s888_s0, %s478_s20 }
  0x1a   : > { %s195_s24 = scalar_lea.vmem [#allocation3], %s477_s11  ;;  %s202_s26 = sshll.u32 %s200_s18, 4  ;;  %s203_s26 = int_to_ptr.hbm [resolvable:$true] %s202_s26 }
  0x1b   : > { %s204_s25 = sshll.u32 %s195_s24, 4  ;;  %p502_p8 = pnand %p510_p5, %p797_p11  ;;  %s205_s25 = int_to_ptr.vmem [resolvable:$true] %s204_s25 }
  0x1c   : > { %s192_s27 = scalar_lea.sflag [#allocation4], %s191_s10  ;;  %213 = sbr.rel (%p778_p3) target bundleno = 220 (0xdc), region = 32 }
  0x1d   : > { %504 = dma.hbm_to_vmem [thread:$0]  (!%p502_p8), %s203_s26, 128, %s205_s25, %s192_s27  }
  0x1e   : > { %s831_s28 = sand.u32 (!%p778_p3), 1, %s697_s13  }
  0x1f   : > { %s480_s30 = sshll.u32 (!%p778_p3), %s831_s28, 3  ;;  %s216_s6 = scalar_lea.sflag (!%p778_p3), [#allocation4], %s831_s28 }
  0x20   : > { %s219_s11 = scalar_lea.vmem (!%p778_p3), [#allocation3], %s480_s30 }
  0x21   : > { %680 = dma.done.wait (%p803_p12), %s216_s6, 128  }
  0x22   : > { %682 = vsyncadd (%p803_p12), %s216_s6, 4294967168 }
  0x23   : > { %684 = dma.done.wait (%p770_p1), [#allocation7], 512  }
  0x24   : > { %686 = vsyncadd (%p770_p1), [#allocation7], 4294966784  ;;  %v265_v0 = vld [vmem:[#allocation6 + $0x18] sm:$0xff]  ;;  %v264_v1 = vld [vmem:[#allocation6 + $0x10] sm:$0xff]  ;;  %vm266_vm0 = vcmask 261120   ;;  %s486_s19 = sshll.u32 %s705_s15, 3 }
  0x25   : > { %282 = vmatpush.msra.mxu0 %v265_v0  ;;  %v263_v2 = vld [vmem:[#allocation6 + $0x8] sm:$0xff]  ;;  %v262_v3 = vld [vmem:[#allocation6] sm:$0xff]  ;;  %v261_v4 = vld [vmem:[%s219_s11] sm:$0xff]  ;;  %s357_s20 = scalar_lea.hbm %s891_s3, %s486_s19  ;;  %s250_s21 = scalar_lea.vmem [#allocation8], %s480_s30 }
  0x26   : > { %v564_v5 = vld [vmem:[%s890_s2] ss:$0 sm:$0xff]  ;;  %s359_s22 = sshll.u32 %s250_s21, 4  ;;  %s361_s18 = sshll.u32 %s357_s20, 4  ;;  %s360_s22 = int_to_ptr.vmem [resolvable:$true] %s359_s22  ;;  %s362_s18 = int_to_ptr.hbm [resolvable:$true] %s361_s18 }
  0x27   : > { %283 = vmatpush.msra.mxu0 %v264_v1  ;;  %s346_s15 = scalar_lea.sflag [#allocation5], %s831_s28  ;;  %s641_s24 = sshra.s32 %s362_s18, 4  ;;  %s642_s24 = int_to_ptr.hbm [resolvable:$true] %s641_s24 }
  0x28   : > { %s643_s25 = scalar_lea.hbm %s642_s24, 8  ;;  %s647_s30 = scalar_lea.hbm %s891_s3, 16 }
  0x29   : > { %284 = vmatpush.msra.mxu0 %v263_v2  ;;  %p644_p1 = scmp.ne.s32.totalorder %s642_s24, %s643_s25  ;;  %p648_p10 = scmp.lt.s32.totalorder %s642_s24, %s891_s3 }
  0x2a   : > { %p649_p11 = scmp.lt.s32.totalorder %s647_s30, %s643_s25 }
  0x2b   : > { %285 = vmatpush.msra.mxu0 %v262_v3  ;;  %p645_p3 = pnand %p644_p1, %p809_p4 }
  0x2c   : > { %483 = vmatmul.msk.f32.vlgmr.msra.gmra.mxu0 %vm266_vm0, %v261_v4  ;;  %p650_p12 = por %p649_p11, %p648_p10 }
  0x2d   : > { %p646_p9 = pneg %p645_p3 }
  0x2f   : > { %p651_p13 = pnand %p650_p12, %p646_p9 }
  0xa9   : > { %v287_v6 = vpop.f32.mrf.mxu0 }
  0xaa   : > { %v300_v7 = vadd.f32 %v564_v5, %v287_v6 }
  0xac   : > { %v302_v8 = vmul.f32 0.70710856, %v300_v7  ;;  %v301_v43 = vmul.f32 0.5, %v300_v7 }
  0xae   : > { %v484_v9 = vclamps-f32 %v302_v8, 3.832507 }
  0xb0   : > { %v305_v10 = vmul.f32 %v484_v9, %v484_v9 }
  0xb2   : > { %v306_v11 = vmul.f32 -2.7261424e-10, %v305_v10  ;;  %v319_v12 = vmul.f32 -1.45660715e-05, %v305_v10 }
  0xb4   : > { %v307_v13 = vadd.f32 2.7706815e-08, %v306_v11  ;;  %v320_v14 = vadd.f32 -0.00021337405, %v319_v12 }
  0xb6   : > { %v308_v15 = vmul.f32 %v307_v13, %v305_v10  ;;  %v321_v16 = vmul.f32 %v320_v14, %v305_v10 }
  0xb8   : > { %v309_v17 = vadd.f32 -2.101024e-06, %v308_v15  ;;  %v322_v18 = vadd.f32 -0.001682827, %v321_v16 }
  0xba   : > { %v310_v19 = vmul.f32 %v309_v17, %v305_v10  ;;  %v323_v20 = vmul.f32 %v322_v18, %v305_v10 }
  0xbc   : > { %v311_v21 = vadd.f32 -5.6925062e-05, %v310_v19  ;;  %v324_v22 = vadd.f32 -0.0073733293, %v323_v20 }
  0xbe   : > { %v312_v23 = vmul.f32 %v311_v21, %v305_v10  ;;  %v325_v24 = vmul.f32 %v324_v22, %v305_v10 }
  0xc0   : > { %v313_v25 = vadd.f32 -0.00073499064, %v312_v23  ;;  %v326_v26 = vadd.f32 -0.014264739, %v325_v24 }
  0xc2   : > { %v314_v27 = vmul.f32 %v313_v25, %v305_v10  ;;  %565 = vrcp.f32 %v326_v26  ;;  %v338_v33 = vand.u32 2147483648, %v326_v26  ;;  %v336_v36 = vand.u32 2147483647, %v326_v26 }
  0xc3   : > { %vm332_vm2 = vweird.f32 %v326_v26 }
  0xc4   : > { %v315_v28 = vadd.f32 -0.0029546, %v314_v27  ;;  %v339_v38 = vor.u32 1.1754944e-38, %v338_v33  ;;  %vm337_vm4 = vcmp.eq.f32.partialorder %v336_v36, 8.507059e+37 }
  0xc6   : > { %v316_v30 = vmul.f32 %v315_v28, %v305_v10 }
  0xc8   : > { %v566_v29 = vpop.eup %565  ;;  %v317_v34 = vadd.f32 -0.016096033, %v316_v30 }
  0xc9   : > { %v328_v31 = vmul.f32 %v566_v29, %v326_v26  ;;  %vm333_vm1 = vweird.f32 %v566_v29 }
  0xca   : > { %vm334_vm3 = vmor %vm332_vm2, %vm333_vm1  ;;  %v318_v39 = vmul.f32 %v484_v9, %v317_v34 }
  0xcb   : > { %v329_v32 = vsub.f32 1.0, %v328_v31 }
  0xcd   : > { %v330_v35 = vmul.f32 %v566_v29, %v329_v32 }
  0xcf   : > { %v331_v37 = vadd.f32 %v566_v29, %v330_v35 }
  0xd1   : > { %v335_v40 = vsel %vm334_vm3, %v566_v29, %v331_v37 }
  0xd2   : > { %v340_v41 = vsel %vm337_vm4, %v339_v38, %v335_v40 }
  0xd3   : > { %v341_v42 = vmul.f32 %v340_v41, %v318_v39 }
  0xd5   : > { %v342_v44 = vadd.f32 1.0, %v341_v42 }
  0xd7   : > { %v343_v45 = vmul.f32 %v342_v44, %v301_v43 }
  0xd9   : > { %344 = vst [vmem:[%s250_s21] sm:$0xff] %v343_v45 }
  0xda   : > { %654 = shalt.err (!%p651_p13)
}
  0xdb   : > { %495 = dma.vmem_to_hbm [thread:$0]  (%p809_p4), %s360_s22, 128, %s362_s18, %s346_s15  }
  0xdc PF: > { %s373_s28 = sand.u32 1, %s693_s12   ;;  %p506_p0 = pnand %p476_p6, %p817_p7 }
  0xdd   : > { %s374_s23 = scalar_lea.sflag [#allocation5], %s373_s28 }
  0xde   : > { %p507_p2 = pneg %p506_p0 }
  0xe0   : > { %688 = dma.done.wait (%p507_p2), %s374_s23, 128  }
  0xe1   : > { %690 = vsyncadd (%p507_p2), %s374_s23, 4294967168  ;;  %s20_s17 = sadd.s32 1, %s713_s17   ;;  %s898_s12 = smov %s697_s13 }
  0xe2   : > { %p17_p5 = scmp.ge.s32.totalorder %s20_s17, 4   ;;  %s899_s13 = smov %s701_s14 }
  0xe3   : > { %s900_s14 = smov %s815_s8  ;;  %s901_s15 = smov %s709_s16 }
  0xe4   : > { %s902_s16 = smov %s904_s29  ;;  %19 = sbr.rel (!%p17_p5) target bundleno = 7 (0x7), region = 93 }
  0xe9   :  { %380 = vsyncpa [#allocation4], 1 }
  0xea   :  { %382 = vsyncpa [#allocation4 + $0x1], 1 }
  0xeb   :  { %383 = vsyncpa [#allocation7], 1 }
  0xec   :  { %384 = vsyncpa [#allocation5], 1 }
  0xed   :  { %386 = vsyncpa [#allocation5 + $0x1], 1 }

</bundles_post_ra>
